<compile_context>
chip_gen: v7x
topology: tpu7x:2x2x1
jax: 0.10.0
libtpu: 0.0.40
codegen_flags: <defaults>
</compile_context>

<pallas_src>
import functools

import jax
import jax.numpy as jnp
from jax.experimental import pallas as pl
from jax.experimental.pallas import tpu as pltpu


def _round_up(x, m):
    return (x + m - 1) // m * m


def _cdiv(a, b):
    return -(-a // b)


# --------------------------------------------------------------------------
# Kernels
# --------------------------------------------------------------------------
def _moco_head_kernel(x_ref, w1_ref, b1_ref, w2_ref, b2_ref, o_ref):
    """Weight-resident path: whole reduction dims live in VMEM."""
    x = x_ref[...].astype(w1_ref.dtype)                     # cast in-kernel
    h = jnp.dot(x, w1_ref[...], preferred_element_type=jnp.float32)
    h = h + b1_ref[...]
    h = jnp.maximum(h, 0.1 * h)                              # LeakyReLU(0.1)
    o = jnp.dot(h.astype(w2_ref.dtype), w2_ref[...],
                preferred_element_type=jnp.float32)
    o_ref[...] = (o + b2_ref[...]).astype(o_ref.dtype)


def _moco_head_kernel_ktiled(x_ref, w1_ref, b1_ref, w2_ref, b2_ref, o_ref,
                             acc_ref):
    """Fallback path: d_in tiled over the last grid axis, f32 accumulator."""
    k = pl.program_id(1)

    @pl.when(k == 0)
    def _init():
        acc_ref[...] = jnp.zeros_like(acc_ref)

    acc_ref[...] += jnp.dot(x_ref[...].astype(w1_ref.dtype), w1_ref[...],
                            preferred_element_type=jnp.float32)

    @pl.when(k == pl.num_programs(1) - 1)
    def _finalize():
        h = acc_ref[...] + b1_ref[...]
        h = jnp.maximum(h, 0.1 * h)                          # LeakyReLU(0.1)
        o = jnp.dot(h.astype(w2_ref.dtype), w2_ref[...],
                    preferred_element_type=jnp.float32)
        o_ref[...] = (o + b2_ref[...]).astype(o_ref.dtype)


# --------------------------------------------------------------------------
# Parameter prep (run once, outside the jitted forward)
# --------------------------------------------------------------------------
def prepare_moco_head_params(w1, b1, w2, b2, compute_dtype=jnp.bfloat16):
    """Pad feature dims to 128-multiples and cast weights to the MXU dtype.

    Do this ONCE per parameter set; the jitted forward takes the padded
    tensors directly so there is no per-call pad/cast HBM pass.
    """
    d_in, hidden = w1.shape
    d_out = w2.shape[1]
    d_in_p = _round_up(d_in, 128)
    h_p = _round_up(hidden, 128)
    d_out_p = _round_up(d_out, 128)

    w1p = jnp.pad(w1, ((0, d_in_p - d_in), (0, h_p - hidden))).astype(compute_dtype)
    w2p = jnp.pad(w2, ((0, h_p - hidden), (0, d_out_p - d_out))).astype(compute_dtype)
    b1p = jnp.pad(b1.reshape(1, -1), ((0, 0), (0, h_p - hidden))).astype(jnp.float32)
    b2p = jnp.pad(b2.reshape(1, -1), ((0, 0), (0, d_out_p - d_out))).astype(jnp.float32)
    return w1p, b1p, w2p, b2p


# --------------------------------------------------------------------------
# Forward wrapper
# --------------------------------------------------------------------------
def _vmem_capacity_bytes():
    try:
        cap = getattr(pltpu.get_tpu_info(), "vmem_capacity_bytes", None)
        if cap:
            return int(cap)
    except Exception:
        pass
    return 64 << 20  # conservative: v7x per-TensorCore VMEM


def _pick_block_b(B):
    # Guarantee >= 2 grid steps whenever the batch allows it (keeps both v7x
    # TensorCores busy); prefer 512/256-row tiles (full MXU passes on
    # v6e/v7x); never below 16 rows.
    for cand in (512, 256, 128, 64, 32, 16):
        if _cdiv(B, cand) >= 2:
            return cand
    return 16


@functools.partial(jax.jit, static_argnames=("out_dim", "block_b", "block_k"))
def moco_head_forward(x, w1p, b1p, w2p, b2p, *, out_dim,
                      block_b=None, block_k=None):
    """Fused MoCoHead forward.

    x:   (B, d_in) in any float dtype (cast to the weight dtype in-kernel).
    w1p: (d_in_p, h_p)  b1p: (1, h_p)      -- pre-padded/cast (see
    w2p: (h_p, d_out_p) b2p: (1, d_out_p)     prepare_moco_head_params).
    Returns (B, out_dim) in x.dtype; matmuls on the MXU with bf16 operands and
    float32 accumulation.
    """
    B, d_in = x.shape
    d_in_p, h_p = w1p.shape
    d_out_p = w2p.shape[1]
    out_dtype = x.dtype

    # ---- batch tiling ----------------------------------------------------
    if block_b is None:
        block_b = _pick_block_b(B)
    block_b = max(16, _round_up(int(block_b), 16))
    B_p = _round_up(B, block_b)

    # ---- pad x only when actually ragged (keep original dtype) ------------
    if (B_p, d_in_p) != (B, d_in):
        x = jnp.pad(x, ((0, B_p - B), (0, d_in_p - d_in)))

    # ---- VMEM budget / path selection -------------------------------------
    xsz = jnp.dtype(x.dtype).itemsize
    csz = jnp.dtype(w1p.dtype).itemsize
    osz = jnp.dtype(out_dtype).itemsize

    vmem_budget = int(_vmem_capacity_bytes() * 0.9)   # ~10% Mosaic headroom

    resident_need = (
        2 * block_b * d_in_p * xsz                     # x tile (double buffered)
        + 2 * block_b * d_out_p * osz                  # out tile (double buffered)
        + (d_in_p * h_p + h_p * d_out_p) * csz         # W1, W2 (Buffered(1))
        + (h_p + d_out_p) * 4                          # biases (Buffered(1))
        + block_b * h_p * 4                            # hidden activation (f32)
    )

    def ktiled_need(bk):
        return (2 * block_b * bk * xsz                 # x tile
                + 2 * bk * h_p * csz                   # W1 k-tile (double buffered)
                + h_p * d_out_p * csz                  # W2
                + (h_p + d_out_p) * 4                  # biases
                + 2 * block_b * d_out_p * osz          # out tile
                + block_b * h_p * 4)                   # f32 accumulator scratch

    use_ktiled = (block_k is not None) or (resident_need > vmem_budget)

    if use_ktiled:
        if block_k is None:
            block_k = 128
            for cand in (1024, 512, 256, 128):
                if cand <= d_in_p and d_in_p % cand == 0 and ktiled_need(cand) <= vmem_budget:
                    block_k = cand
                    break
        block_k = min(int(block_k), d_in_p)
        if d_in_p % block_k != 0:
            block_k = 128                              # d_in_p is always 128-aligned
        vmem_needed = ktiled_need(block_k)
    else:
        vmem_needed = resident_need

    vmem_limit = int(min(max(int(vmem_needed * 1.25) + (2 << 20), 32 << 20),
                         vmem_budget))

    flops = 2 * B_p * (d_in_p * h_p + h_p * d_out_p)
    bytes_accessed = (B_p * d_in_p * xsz + d_in_p * h_p * csz
                      + h_p * d_out_p * csz + (h_p + d_out_p) * 4
                      + B_p * d_out_p * osz)
    cost = pl.CostEstimate(flops=flops, transcendentals=0,
                           bytes_accessed=bytes_accessed)

    # ---- pallas_call -------------------------------------------------------
    if not use_ktiled:
        grid = (B_p // block_b,)
        out = pl.pallas_call(
            _moco_head_kernel,
            out_shape=jax.ShapeDtypeStruct((B_p, d_out_p), out_dtype),
            grid_spec=pltpu.PrefetchScalarGridSpec(
                num_scalar_prefetch=0,
                grid=grid,
                in_specs=[
                    pl.BlockSpec((block_b, d_in_p), lambda i: (i, 0)),
                    # Grid-invariant operands: single buffer (DMA'd once).
                    pl.BlockSpec((d_in_p, h_p), lambda i: (0, 0),
                                 pipeline_mode=pl.Buffered(1)),
                    pl.BlockSpec((1, h_p), lambda i: (0, 0),
                                 pipeline_mode=pl.Buffered(1)),
                    pl.BlockSpec((h_p, d_out_p), lambda i: (0, 0),
                                 pipeline_mode=pl.Buffered(1)),
                    pl.BlockSpec((1, d_out_p), lambda i: (0, 0),
                                 pipeline_mode=pl.Buffered(1)),
                ],
                out_specs=pl.BlockSpec((block_b, d_out_p), lambda i: (i, 0)),
            ),
            compiler_params=pltpu.CompilerParams(
                dimension_semantics=("parallel",),       # batch over TCs
                vmem_limit_bytes=vmem_limit),
            cost_estimate=cost,
        )(x, w1p, b1p, w2p, b2p)
    else:
        grid = (B_p // block_b, d_in_p // block_k)
        out = pl.pallas_call(
            _moco_head_kernel_ktiled,
            out_shape=jax.ShapeDtypeStruct((B_p, d_out_p), out_dtype),
            grid_spec=pltpu.PrefetchScalarGridSpec(
                num_scalar_prefetch=0,
                grid=grid,
                in_specs=[
                    pl.BlockSpec((block_b, block_k), lambda i, k: (i, k)),
                    pl.BlockSpec((block_k, h_p), lambda i, k: (k, 0)),
                    pl.BlockSpec((1, h_p), lambda i, k: (0, 0),
                                 pipeline_mode=pl.Buffered(1)),
                    pl.BlockSpec((h_p, d_out_p), lambda i, k: (0, 0),
                                 pipeline_mode=pl.Buffered(1)),
                    pl.BlockSpec((1, d_out_p), lambda i, k: (0, 0),
                                 pipeline_mode=pl.Buffered(1)),
                ],
                out_specs=pl.BlockSpec((block_b, d_out_p), lambda i, k: (i, 0)),
                scratch_shapes=[pltpu.VMEM((block_b, h_p), jnp.float32)],
            ),
            compiler_params=pltpu.CompilerParams(
                dimension_semantics=("parallel", "arbitrary"),
                vmem_limit_bytes=vmem_limit),
            cost_estimate=cost,
        )(x, w1p, b1p, w2p, b2p)

    # Slice off batch / lane padding.
    return out[:B, :out_dim]


# --------------------------------------------------------------------------
# Init mimicking nn.Linear (uniform(-1/sqrt(fan_in), 1/sqrt(fan_in)))
# --------------------------------------------------------------------------
def init_moco_head_params(key, input_dim, hidden_dim, out_dim,
                          dtype=jnp.float32):
    k1, k2, k3, k4 = jax.random.split(key, 4)
    lim1 = 1.0 / (input_dim ** 0.5)
    lim2 = 1.0 / (hidden_dim ** 0.5)
    # Stored as (in_dim, out_dim) == transpose of PyTorch's (out, in) weight.
    w1 = jax.random.uniform(k1, (input_dim, hidden_dim), dtype, -lim1, lim1)
    b1 = jax.random.uniform(k2, (1, hidden_dim), dtype, -lim1, lim1)
    w2 = jax.random.uniform(k3, (hidden_dim, out_dim), dtype, -lim2, lim2)
    b2 = jax.random.uniform(k4, (1, out_dim), dtype, -lim2, lim2)
    return w1, b1, w2, b2


def _ref_forward(x, w1, b1, w2, b2):
    """Plain-JAX reference with the same bf16-operand / f32-accumulate math."""
    xb, w1b, w2b = (t.astype(jnp.bfloat16) for t in (x, w1, w2))
    h = jnp.dot(xb, w1b, preferred_element_type=jnp.float32) + b1
    h = jnp.where(h > 0, h, 0.1 * h)
    return jnp.dot(h.astype(jnp.bfloat16), w2b,
                   preferred_element_type=jnp.float32) + b2


if __name__ == "__main__":
    # --- Test 1: weight-resident path. Dims deliberately NOT 128-multiples
    # and batch not a multiple of the tile, so padding + multi-step grid are
    # exercised (block_b=32 -> padded batch 64, grid=(2,)).
    batch, input_dim, hidden_dim, out_dim = 48, 160, 96, 72
    key = jax.random.PRNGKey(0)
    kx, kp = jax.random.split(key)
    x = jax.random.normal(kx, (batch, input_dim), jnp.float32)
    w1, b1, w2, b2 = init_moco_head_params(kp, input_dim, hidden_dim, out_dim)
    params = prepare_moco_head_params(w1, b1, w2, b2)

    out = moco_head_forward(x, *params, out_dim=out_dim, block_b=32)
    jax.block_until_ready(out)

    ref = _ref_forward(x, w1, b1, w2, b2)
    assert out.shape == (batch, out_dim)
    assert jnp.allclose(out, ref, atol=5e-3, rtol=5e-3), \
        float(jnp.max(jnp.abs(out - ref)))

    # --- Test 2: K-tiled fallback path (d_in split over the reduction axis
    # with an f32 accumulator), forced via an explicit block_k.
    batch2, d_in2, hid2, out2 = 40, 256, 128, 64
    kx2, kp2 = jax.random.split(jax.random.PRNGKey(1))
    x2 = jax.random.normal(kx2, (batch2, d_in2), jnp.float32)
    w1b_, b1b_, w2b_, b2b_ = init_moco_head_params(kp2, d_in2, hid2, out2)
    params2 = prepare_moco_head_params(w1b_, b1b_, w2b_, b2b_)

    out_k = moco_head_forward(x2, *params2, out_dim=out2,
                              block_b=16, block_k=128)
    jax.block_until_ready(out_k)

    ref_k = _ref_forward(x2, w1b_, b1b_, w2b_, b2b_)
    assert out_k.shape == (batch2, out2)
    assert jnp.allclose(out_k, ref_k, atol=5e-3, rtol=5e-3), \
        float(jnp.max(jnp.abs(out_k - ref_k)))

    print("KERNEL_OK")
</pallas_src>

<mosaic_0001>
module attributes {stable_mosaic.version = 11 : i64} {
  func.func @_moco_head_kernel(%arg0: i32, %arg1: memref<32x256xf32, #tpu.memory_space<vmem>>, %arg2: memref<256x128xbf16, #tpu.memory_space<vmem>>, %arg3: memref<1x128xf32, #tpu.memory_space<vmem>>, %arg4: memref<128x128xbf16, #tpu.memory_space<vmem>>, %arg5: memref<1x128xf32, #tpu.memory_space<vmem>>, %arg6: memref<32x128xf32, #tpu.memory_space<vmem>>) attributes {dimension_semantics = [#tpu.dimension_semantics<parallel>], iteration_bounds = array<i64: 2>, scalar_prefetch = 0 : i64, scratch_operands = 0 : i64, tpu.core_type = #tpu.core_type<tc>, window_params = [{transform_indices = @transform_0, window_bounds = array<i64: 32, 256>}, {pipeline_mode = #tpu.pipeline_mode<synchronous>, transform_indices = @transform_1, window_bounds = array<i64: 256, 128>}, {pipeline_mode = #tpu.pipeline_mode<synchronous>, transform_indices = @transform_2, window_bounds = array<i64: 1, 128>}, {pipeline_mode = #tpu.pipeline_mode<synchronous>, transform_indices = @transform_3, window_bounds = array<i64: 128, 128>}, {pipeline_mode = #tpu.pipeline_mode<synchronous>, transform_indices = @transform_4, window_bounds = array<i64: 1, 128>}, {transform_indices = @transform_5, window_bounds = array<i64: 32, 128>}]} {
    %c0 = arith.constant 0 : index
    %c0_0 = arith.constant 0 : index
    %0 = vector.load %arg1[%c0, %c0_0] : memref<32x256xf32, #tpu.memory_space<vmem>>, vector<32x256xf32>
    %1 = arith.truncf %0 : vector<32x256xf32> to vector<32x256xbf16>
    %c0_1 = arith.constant 0 : index
    %c0_2 = arith.constant 0 : index
    %2 = vector.load %arg2[%c0_1, %c0_2] : memref<256x128xbf16, #tpu.memory_space<vmem>>, vector<256x128xbf16>
    %cst = arith.constant dense<0.000000e+00> : vector<32x128xf32>
    %3 = tpu.matmul %1, %2, %cst {dimension_numbers = #tpu.dot_dimension_numbers<[1], [0], [0], [1], [0, 0, 1, 1], [], []>} : vector<32x256xbf16>, vector<256x128xbf16>, vector<32x128xf32> -> vector<32x128xf32>
    %c0_3 = arith.constant 0 : index
    %c0_4 = arith.constant 0 : index
    %4 = vector.load %arg3[%c0_3, %c0_4] : memref<1x128xf32, #tpu.memory_space<vmem>>, vector<1x128xf32>
    %5 = vector.broadcast %4 : vector<1x128xf32> to vector<32x128xf32>
    %6 = arith.addf %3, %5 : vector<32x128xf32>
    %cst_5 = arith.constant 1.000000e-01 : f32
    %7 = vector.broadcast %cst_5 : f32 to vector<32x128xf32>
    %8 = arith.mulf %7, %6 : vector<32x128xf32>
    %9 = arith.maximumf %6, %8 : vector<32x128xf32>
    %10 = arith.truncf %9 : vector<32x128xf32> to vector<32x128xbf16>
    %c0_6 = arith.constant 0 : index
    %c0_7 = arith.constant 0 : index
    %11 = vector.load %arg4[%c0_6, %c0_7] : memref<128x128xbf16, #tpu.memory_space<vmem>>, vector<128x128xbf16>
    %cst_8 = arith.constant dense<0.000000e+00> : vector<32x128xf32>
    %12 = tpu.matmul %10, %11, %cst_8 {dimension_numbers = #tpu.dot_dimension_numbers<[1], [0], [0], [1], [0, 0, 1, 1], [], []>} : vector<32x128xbf16>, vector<128x128xbf16>, vector<32x128xf32> -> vector<32x128xf32>
    %c0_9 = arith.constant 0 : index
    %c0_10 = arith.constant 0 : index
    %13 = vector.load %arg5[%c0_9, %c0_10] : memref<1x128xf32, #tpu.memory_space<vmem>>, vector<1x128xf32>
    %14 = vector.broadcast %13 : vector<1x128xf32> to vector<32x128xf32>
    %15 = arith.addf %12, %14 : vector<32x128xf32>
    %c0_11 = arith.constant 0 : index
    %c0_12 = arith.constant 0 : index
    %16 = vector.load %arg6[%c0_11, %c0_12] : memref<32x128xf32, #tpu.memory_space<vmem>>, vector<32x128xf32>
    tpu.vector_store %arg6[%c0_11, %c0_12], %15 {strides = array<i32>} : memref<32x128xf32, #tpu.memory_space<vmem>>, vector<32x128xf32>,
    return
  }
  func.func @transform_0(%arg0: i32) -> (i32, i32) {
    %c0_i32 = arith.constant 0 : i32
    %c0_i32_0 = arith.constant 0 : i32
    return %arg0, %c0_i32 : i32, i32
  }
  func.func @transform_1(%arg0: i32) -> (i32, i32) {
    %c0_i32 = arith.constant 0 : i32
    %c0_i32_0 = arith.constant 0 : i32
    %c0_i32_1 = arith.constant 0 : i32
    return %c0_i32, %c0_i32_0 : i32, i32
  }
  func.func @transform_2(%arg0: i32) -> (i32, i32) {
    %c0_i32 = arith.constant 0 : i32
    %c0_i32_0 = arith.constant 0 : i32
    %c0_i32_1 = arith.constant 0 : i32
    return %c0_i32, %c0_i32_0 : i32, i32
  }
  func.func @transform_3(%arg0: i32) -> (i32, i32) {
    %c0_i32 = arith.constant 0 : i32
    %c0_i32_0 = arith.constant 0 : i32
    %c0_i32_1 = arith.constant 0 : i32
    return %c0_i32, %c0_i32_0 : i32, i32
  }
  func.func @transform_4(%arg0: i32) -> (i32, i32) {
    %c0_i32 = arith.constant 0 : i32
    %c0_i32_0 = arith.constant 0 : i32
    %c0_i32_1 = arith.constant 0 : i32
    return %c0_i32, %c0_i32_0 : i32, i32
  }
  func.func @transform_5(%arg0: i32) -> (i32, i32) {
    %c0_i32 = arith.constant 0 : i32
    %c0_i32_0 = arith.constant 0 : i32
    return %arg0, %c0_i32 : i32, i32
  }
}

</mosaic_0001>

<bundles_post_ra>
// kernel: moco_head_forward.1
= control target key start
LH: loop header
LB: loop body
LE: loop exit
PB: predicated region body
PF: predicated region fallthrough
CT: control target
= control target key end

     0   :  { %s785_s18 = smov 0   ;;  %s894_s0 = inlined_call_operand.vmem [shape: f32[64,256], index: 0, kind: input, shape index: {}]   ;;  %s895_s1 = inlined_call_operand.vmem [shape: bf16[256,128], index: 1, kind: input, shape index: {}]   ;;  %s896_s2 = inlined_call_operand.vmem [shape: f32[1,128], index: 2, kind: input, shape index: {}]   ;;  %s897_s3 = inlined_call_operand.vmem [shape: bf16[128,128], index: 3, kind: input, shape index: {}]   ;;  %s898_s4 = inlined_call_operand.vmem [shape: f32[1,128], index: 4, kind: input, shape index: {}]   ;;  %s899_s5 = inlined_call_operand.vmem [shape: f32[64,128], index: 5, kind: output, shape index: {}]  }
   0x1 LB: > { %s618_s19 = sadd.s32 4294967295, %s753_s18   ;;  %p622_p0 = scmp.ge.s32.totalorder %s753_s18, 1  ;;  %s753_s18 = sphi %s785_s18, %s15_s18  }
   0x2   : > { %p189_p1 = scmp.lt.s32.totalorder %s753_s18, 3 }
   0x4   : > { %p190_p2 = pnand %p622_p0, %p189_p1 }
   0x5   : > { %v723_v0 = vld [vmem:[%s895_s1 + $0x40] sm:$0xff] (!%p190_p2)   ;;  %s623_s22 = sshll.u32 (!%p190_p2), %s618_s19, 2  ;;  %v725_v2 = vld [vmem:[%s895_s1 + $0x48] sm:$0xff] (!%p190_p2)   ;;  %v727_v4 = vld [vmem:[%s895_s1 + $0x50] sm:$0xff] (!%p190_p2)  }
   0x6   : > { %193 = sbr.rel (%p190_p2) target bundleno = 489 (0x1e9), region = 40  ;;  %v724_v1 = vld [vmem:[%s895_s1] sm:$0xff] (!%p190_p2)   ;;  %657 = vmatprep.subr.bf16.mxu0 (!%p190_p2), %v723_v0  ;;  %p219_p3 = scmp.lt.s32.totalorder (!%p190_p2), %s623_s22, 7  ;;  %v726_v3 = vld [vmem:[%s895_s1 + $0x8] sm:$0xff] (!%p190_p2)   ;;  %v728_v5 = vld [vmem:[%s895_s1 + $0x10] sm:$0xff] (!%p190_p2)  }
   0x7   : > { %658 = vmatpush3.bf16.msra.mxu0 (!%p190_p2), %v724_v1  ;;  %v729_v6 = vld [vmem:[%s895_s1 + $0x58] sm:$0xff] (!%p190_p2)   ;;  %v731_v8 = vld [vmem:[%s895_s1 + $0x60] sm:$0xff] (!%p190_p2)   ;;  %v733_v10 = vld [vmem:[%s895_s1 + $0x68] sm:$0xff] (!%p190_p2)  }
   0x8   : > { %659 = vmatprep.subr.bf16.mxu0 (!%p190_p2), %v725_v2  ;;  %v730_v7 = vld [vmem:[%s895_s1 + $0x18] sm:$0xff] (!%p190_p2)   ;;  %v732_v9 = vld [vmem:[%s895_s1 + $0x20] sm:$0xff] (!%p190_p2)   ;;  %v734_v14 = vld [vmem:[%s895_s1 + $0x28] sm:$0xff] (!%p190_p2)  }
   0x9   : > { %v735_v15 = vld [vmem:[%s895_s1 + $0x70] sm:$0xff] (!%p190_p2)   ;;  %v739_v16 = vld [vmem:[%s897_s3] sm:$0xff] (!%p190_p2)   ;;  %v740_v17 = vld [vmem:[%s897_s3 + $0x8] sm:$0xff] (!%p190_p2)  }
   0xa   : > { %v736_v18 = vld [vmem:[%s895_s1 + $0x30] sm:$0xff] (!%p190_p2)   ;;  %695 = vmatprep.subr.bf16.mxu1 (!%p190_p2), %v739_v16  ;;  %v737_v20 = vld [vmem:[%s895_s1 + $0x78] sm:$0xff] (!%p190_p2)   ;;  %v743_v32 = vld [vmem:[%s897_s3 + $0x20] sm:$0xff] (!%p190_p2)  }
   0xb   : > { %660 = vmatpush3.bf16.msra.mxu0 (!%p190_p2), %v726_v3  ;;  %v741_v19 = vld [vmem:[%s897_s3 + $0x10] sm:$0xff] (!%p190_p2)   ;;  %696 = vmatpush3.bf16.msra.mxu1 (!%p190_p2), %v739_v16  ;;  %v738_v21 = vld [vmem:[%s895_s1 + $0x38] sm:$0xff] (!%p190_p2)   ;;  %v744_v33 = vld [vmem:[%s897_s3 + $0x28] sm:$0xff] (!%p190_p2)  }
   0xc   : > { %661 = vmatprep.subr.bf16.mxu0 (!%p190_p2), %v727_v4  ;;  %697 = vmatprep.subr.bf16.mxu1 (!%p190_p2), %v740_v17  ;;  %v742_v31 = vld [vmem:[%s897_s3 + $0x18] sm:$0xff] (!%p190_p2)   ;;  %v745_v34 = vld [vmem:[%s897_s3 + $0x30] sm:$0xff] (!%p190_p2)   ;;  %v628_v37 = vld [vmem:[%s896_s2] ss:$0 sm:$0xff] (!%p190_p2) }
   0xd   : > { %s901_s22 = smov (!%p219_p3, %s623_s22), 7  ;;  %v746_v35 = vld [vmem:[%s897_s3 + $0x38] sm:$0xff]   ;;  %v645_v63 = vld [vmem:[%s898_s4] ss:$0 sm:$0xff] }
   0xe   : > { %s656_s10 = sshll.u32 %s901_s22, 4  ;;  %s627_s29 = sshll.u32 %s901_s22, 3 }
   0xf   : > { %662 = vmatpush3.bf16.msra.mxu0 %v728_v5  ;;  %s826_s17 = scalar_lea.vmem %s894_s0, %s656_s10  ;;  %698 = vmatpush3.bf16.msra.mxu1 %v740_v17  ;;  %s229_s9 = scalar_lea.vmem %s899_s5, %s627_s29 }
  0x10   : > { %663 = vmatprep.subr.bf16.mxu0 %v729_v6  ;;  %v233_v11 = vld [vmem:[%s826_s17 + $0x8] sm:$0xff]  ;;  %v235_v12 = vld [vmem:[%s826_s17 + $0x18] sm:$0xff]  ;;  %v232_v22 = vld [vmem:[%s826_s17] sm:$0xff]  ;;  %699 = vmatprep.subr.bf16.mxu1 %v741_v19 }
  0x11   : > { %v241_v13 = vpack.c.bf16 %v235_v12, %v233_v11  ;;  %v234_v23 = vld [vmem:[%s826_s17 + $0x10] sm:$0xff]  ;;  %v237_v24 = vld [vmem:[%s826_s17 + $0x28] sm:$0xff]  ;;  %v239_v25 = vld [vmem:[%s826_s17 + $0x38] sm:$0xff] }
  0x12   : > { %v240_v26 = vpack.c.bf16 %v234_v23, %v232_v22  ;;  %v243_v27 = vpack.c.bf16 %v239_v25, %v237_v24  ;;  %v236_v28 = vld [vmem:[%s826_s17 + $0x20] sm:$0xff]  ;;  %v238_v29 = vld [vmem:[%s826_s17 + $0x30] sm:$0xff] }
  0x13   : > { %664 = vmatpush3.bf16.msra.mxu0 %v730_v7  ;;  %411 = vmatprep.mubr.bf16.mxu0 %v241_v13  ;;  %v242_v30 = vpack.c.bf16 %v238_v29, %v236_v28 }
  0x14   : > { %665 = vmatprep.subr.bf16.mxu0 %v731_v8  ;;  %700 = vmatpush3.bf16.msra.mxu1 %v741_v19 }
  0x15   : > { %701 = vmatprep.subr.bf16.mxu1 %v742_v31 }
  0x17   : > { %666 = vmatpush3.bf16.msra.mxu0 %v732_v9 }
  0x18   : > { %667 = vmatprep.subr.bf16.mxu0 %v733_v10  ;;  %702 = vmatpush3.bf16.msra.mxu1 %v742_v31 }
  0x19   : > { %703 = vmatprep.subr.bf16.mxu1 %v743_v32 }
  0x1b   : > { %668 = vmatpush3.bf16.msra.mxu0 %v734_v14 }
  0x1c   : > { %669 = vmatprep.subr.bf16.mxu0 %v735_v15  ;;  %704 = vmatpush3.bf16.msra.mxu1 %v743_v32 }
  0x1d   : > { %705 = vmatprep.subr.bf16.mxu1 %v744_v33 }
  0x1f   : > { %670 = vmatpush3.bf16.msra.mxu0 %v736_v18 }
  0x20   : > { %671 = vmatprep.subr.bf16.mxu0 %v737_v20  ;;  %706 = vmatpush3.bf16.msra.mxu1 %v744_v33 }
  0x21   : > { %707 = vmatprep.subr.bf16.mxu1 %v745_v34 }
  0x23   : > { %672 = vmatpush3.bf16.msra.mxu0 %v738_v21 }
  0x24   : > { %708 = vmatpush3.bf16.msra.mxu1 %v745_v34 }
  0x25   : > { %709 = vmatprep.subr.bf16.mxu1 %v746_v35 }
  0x26   : > { %412 = vmatmul.mubr.bf16.vlgmr.msra.gmra.mrb[0].mxu0 %v240_v26 }
  0x27   : > { %419 = vmatprep.mubr.bf16.mxu0 %v243_v27 }
  0x28   : > { %710 = vmatpush3.bf16.msra.mxu1 %v746_v35 }
  0x2e   : > { %420 = vmatmul.mubr.bf16.gmra.mrb[4].mxu0 %v242_v30 }
  0xf9   : > { %v673_v36 = vpop.f32.mrb[0].mxu0 }
  0xfa   : > { %v674_v38 = vpop.f32.mrb[1].mxu0 }
  0xfb   : > { %v675_v39 = vadd.f32 %v674_v38, %v673_v36  ;;  %v676_v40 = vpop.f32.mrb[2].mxu0 }
  0xfc   : > { %v677_v41 = vpop.f32.mrb[3].mxu0 }
  0xfd   : > { %v414_v42 = vadd.f32 %v675_v39, %v628_v37  ;;  %v678_v43 = vadd.f32 %v677_v41, %v676_v40 }
  0xff   : > { %v417_v44 = vadd.f32 %v678_v43, %v628_v37  ;;  %v428_v45 = vmul.f32 0.1, %v414_v42 }
 0x101   : > { %v679_v46 = vpop.f32.mrb[4].mxu0  ;;  %v429_v47 = vmul.f32 0.1, %v417_v44  ;;  %v432_v51 = vmax.f32 %v414_v42, %v428_v45 }
 0x102   : > { %v680_v48 = vpop.f32.mrb[5].mxu0 }
 0x103   : > { %v681_v49 = vadd.f32 %v680_v48, %v679_v46  ;;  %v682_v50 = vpop.f32.mrb[6].mxu0  ;;  %v433_v52 = vmax.f32 %v417_v44, %v429_v47 }
 0x104   : > { %v683_v53 = vpop.f32.mrb[7].mxu0 }
 0x105   : > { %v422_v54 = vadd.f32 %v681_v49, %v628_v37  ;;  %v684_v55 = vadd.f32 %v683_v53, %v682_v50  ;;  %v436_v56 = vpack.c.bf16 %v433_v52, %v432_v51 }
 0x107   : > { %v430_v57 = vmul.f32 0.1, %v422_v54  ;;  %v425_v58 = vadd.f32 %v684_v55, %v628_v37  ;;  %711 = vmatprep.mubr.bf16.mxu1 %v436_v56 }
 0x109   : > { %v431_v59 = vmul.f32 0.1, %v425_v58  ;;  %v434_v60 = vmax.f32 %v422_v54, %v430_v57 }
 0x10b   : > { %v435_v61 = vmax.f32 %v425_v58, %v431_v59 }
 0x10d   : > { %v437_v62 = vpack.c.bf16 %v435_v61, %v434_v60 }
 0x10f   : > { %712 = vmatmul.mubr.bf16.vlgmr.msra.gmra.mrb[0].mxu1 %v437_v62 }
 0x1e2   : > { %v713_v0 = vpop.f32.mrb[0].mxu1 }
 0x1e3   : > { %v543_v1 = vpop.f32.mrb[1].mxu1  ;;  %v552_v6 = vadd.f32 %v713_v0, %v645_v63 }
 0x1e4   : > { %v544_v2 = vadd.f32 %v645_v63, %v543_v1  ;;  %v714_v3 = vpop.f32.mrb[2].mxu1 }
 0x1e5   : > { %v546_v4 = vpop.f32.mrb[3].mxu1  ;;  %v555_v7 = vadd.f32 %v714_v3, %v645_v63  ;;  %560 = vst [vmem:[%s229_s9 + $0x10] sm:$0xff] %v552_v6 }
 0x1e6   : > { %558 = vst [vmem:[%s229_s9] sm:$0xff] %v544_v2  ;;  %v547_v5 = vadd.f32 %v645_v63, %v546_v4 }
 0x1e7   : > { %561 = vst [vmem:[%s229_s9 + $0x18] sm:$0xff] %v555_v7 }
 0x1e8   : > { %559 = vst [vmem:[%s229_s9 + $0x8] sm:$0xff] %v547_v5 }
 0x1e9 PF: > { %s15_s18 = sadd.s32 1, %s753_s18  }
 0x1ea   : > { %p12_p4 = scmp.ge.s32.totalorder %s15_s18, 4  }
 0x1ec   :  { %14 = sbr.rel (!%p12_p4) target bundleno = 1 (0x1), region = 70 }

</bundles_post_ra>
